<compile_context>
chip_gen: v6e
topology: v6e:2x2x1
jax: 0.10.0
libtpu: 0.0.40
codegen_flags: <defaults>
</compile_context>

<pallas_src>
import jax
import jax.numpy as jnp
from jax.experimental import pallas as pl
from jax.experimental.pallas import tpu as pltpu

BN_EPS = 1e-5


# ----------------------------------------------------------------------------
# Kernel: one batch tile, all three (BN-folded) linear stages fused.
# ----------------------------------------------------------------------------
def _encoder_kernel(x_ref, w1_ref, b1_ref, w2_ref, b2_ref, w3_ref, b3_ref,
                    z_ref):
    """z = ( relu( relu(x@W1'+b1') @ W2'+b2' ) ) @ W3 + b3   (BN pre-folded)."""
    h = jnp.dot(x_ref[...], w1_ref[...],
                preferred_element_type=jnp.float32) + b1_ref[...]
    h = jnp.maximum(h, 0.0)          # ReLU  (Dropout(0.2) is identity in eval)
    h = jnp.dot(h, w2_ref[...],
                preferred_element_type=jnp.float32) + b2_ref[...]
    h = jnp.maximum(h, 0.0)          # ReLU
    z_ref[...] = (jnp.dot(h, w3_ref[...],
                          preferred_element_type=jnp.float32)
                  + b3_ref[...]).astype(z_ref.dtype)


# ----------------------------------------------------------------------------
# Host-side helpers.
# ----------------------------------------------------------------------------
def _round_up(x, m):
    return (x + m - 1) // m * m


def _fold_bn(w, b, gamma, beta, mean, var):
    """Fold eval-mode BatchNorm1d into the preceding Linear (exact)."""
    scale = gamma * jax.lax.rsqrt(var + BN_EPS)      # (1, feat)
    return w * scale, (b - mean) * scale + beta


def encoder_forward(x, params, *, batch_tile=512):
    """Pallas forward:  z = en_to_la(encoder(x))  (2-D input, eval mode)."""
    B, input_dim = x.shape
    latent_dim = params["w3"].shape[1]

    # --- fold BN1/BN2 into linear_1/linear_2 (host side, once) -------------
    w1, b1 = _fold_bn(params["w1"], params["b1"], params["g1"],
                      params["be1"], params["m1"], params["v1"])
    w2, b2 = _fold_bn(params["w2"], params["b2"], params["g2"],
                      params["be2"], params["m2"], params["v2"])
    w3, b3 = params["w3"], params["b3"]

    # --- lane-dense output: pad latent dim up to a multiple of 128 ----------
    latent_pad = _round_up(latent_dim, 128)
    if latent_pad != latent_dim:
        w3 = jnp.pad(w3, ((0, 0), (0, latent_pad - latent_dim)))
        b3 = jnp.pad(b3, ((0, 0), (0, latent_pad - latent_dim)))

    # --- batch tiling: tile is a multiple of 8 sublanes, pad B to fit -------
    tb = max(8, min(batch_tile, _round_up(B, 8)))
    Bp = _round_up(B, tb)
    if Bp != B:
        x = jnp.pad(x, ((0, Bp - B), (0, 0)))

    enc_dim = w1.shape[1]
    enc_out_dim = w2.shape[1]

    resident = lambda i: (0, 0)   # weights/biases stay VMEM-resident

    z_pad = pl.pallas_call(
        _encoder_kernel,
        out_shape=jax.ShapeDtypeStruct((Bp, latent_pad), jnp.float32),
        grid=(Bp // tb,),
        in_specs=[
            pl.BlockSpec((tb, input_dim), lambda i: (i, 0)),        # x tile
            pl.BlockSpec((input_dim, enc_dim), resident),           # W1'
            pl.BlockSpec((1, enc_dim), resident),                   # b1'
            pl.BlockSpec((enc_dim, enc_out_dim), resident),         # W2'
            pl.BlockSpec((1, enc_out_dim), resident),               # b2'
            pl.BlockSpec((enc_out_dim, latent_pad), resident),      # W3 (padded)
            pl.BlockSpec((1, latent_pad), resident),                # b3 (padded)
        ],
        out_specs=pl.BlockSpec((tb, latent_pad), lambda i: (i, 0)),
        compiler_params=pltpu.CompilerParams(
            dimension_semantics=("parallel",)),
    )(x, w1, b1, w2, b2, w3, b3)

    return z_pad[:B, :latent_dim]


# Pure-JAX reference (un-folded BN) used to validate the kernel + folding.
def encoder_reference(x, params):
    def bn(h, g, be, m, v):
        return (h - m) * jax.lax.rsqrt(v + BN_EPS) * g + be

    h = x @ params["w1"] + params["b1"]
    h = jnp.maximum(bn(h, params["g1"], params["be1"],
                       params["m1"], params["v1"]), 0.0)
    h = h @ params["w2"] + params["b2"]
    h = jnp.maximum(bn(h, params["g2"], params["be2"],
                       params["m2"], params["v2"]), 0.0)
    return h @ params["w3"] + params["b3"]


def init_params(key, input_dim, encoder_dim, encoder_out_dim, latent_dim):
    """Matches Encoder.initialize_weights(): Linear W ~ N(0, 0.01), b = 0;
    BatchNorm gamma = 1, beta = 0.  Running stats are filled with non-trivial
    deterministic values (as they would be after training) so that the
    host-side BN folding is actually exercised."""
    k1, k2, k3, km1, kv1, km2, kv2 = jax.random.split(key, 7)

    def lin(k, fan_in, fan_out):
        # stored pre-transposed: (in, out) so the kernel computes x @ W + b
        w = (jax.random.normal(k, (fan_in, fan_out)) * 0.01).astype(jnp.float32)
        b = jnp.zeros((1, fan_out), jnp.float32)
        return w, b

    w1, b1 = lin(k1, input_dim, encoder_dim)
    w2, b2 = lin(k2, encoder_dim, encoder_out_dim)
    w3, b3 = lin(k3, encoder_out_dim, latent_dim)

    def bn(km, kv, feat):
        gamma = jnp.ones((1, feat), jnp.float32)
        beta = jnp.zeros((1, feat), jnp.float32)
        mean = (0.1 * jax.random.normal(km, (1, feat))).astype(jnp.float32)
        var = (1.0 + 0.2 * jax.random.uniform(kv, (1, feat))).astype(jnp.float32)
        return gamma, beta, mean, var

    g1, be1, m1, v1 = bn(km1, kv1, encoder_dim)
    g2, be2, m2, v2 = bn(km2, kv2, encoder_out_dim)

    return dict(w1=w1, b1=b1, g1=g1, be1=be1, m1=m1, v1=v1,
                w2=w2, b2=b2, g2=g2, be2=be2, m2=m2, v2=v2,
                w3=w3, b3=b3)


if __name__ == "__main__":
    key = jax.random.PRNGKey(0)
    kp, kx = jax.random.split(key)

    # Small shapes consistent with the module's 2-D forward.
    B = 64
    input_dim = 32
    encoder_dim = 64
    encoder_out_dim = 32
    latent_dim = 16

    params = init_params(kp, input_dim, encoder_dim, encoder_out_dim, latent_dim)
    x = jax.random.normal(kx, (B, input_dim), dtype=jnp.float32)

    fwd = jax.jit(encoder_forward, static_argnames=("batch_tile",))
    z = fwd(x, params, batch_tile=512)
    z = jax.block_until_ready(z)

    assert z.shape == (B, latent_dim)

    z_ref = jax.block_until_ready(encoder_reference(x, params))
    assert jnp.allclose(z, z_ref, atol=1e-4, rtol=1e-3), (
        float(jnp.max(jnp.abs(z - z_ref))))

    print("KERNEL_OK")
</pallas_src>

<mosaic_0001>
module attributes {stable_mosaic.version = 11 : i64} {
  func.func @_encoder_kernel(%arg0: i32, %arg1: memref<64x32xf32, #tpu.memory_space<vmem>>, %arg2: memref<32x64xf32, #tpu.memory_space<vmem>>, %arg3: memref<1x64xf32, #tpu.memory_space<vmem>>, %arg4: memref<64x32xf32, #tpu.memory_space<vmem>>, %arg5: memref<1x32xf32, #tpu.memory_space<vmem>>, %arg6: memref<32x128xf32, #tpu.memory_space<vmem>>, %arg7: memref<1x128xf32, #tpu.memory_space<vmem>>, %arg8: memref<64x128xf32, #tpu.memory_space<vmem>>) attributes {dimension_semantics = [#tpu.dimension_semantics<parallel>], iteration_bounds = array<i64: 1>, scalar_prefetch = 0 : i64, scratch_operands = 0 : i64, tpu.core_type = #tpu.core_type<tc>, window_params = [{transform_indices = @transform_0, window_bounds = array<i64: 64, 32>}, {pipeline_mode = #tpu.pipeline_mode<synchronous>, transform_indices = @transform_1, window_bounds = array<i64: 32, 64>}, {pipeline_mode = #tpu.pipeline_mode<synchronous>, transform_indices = @transform_2, window_bounds = array<i64: 1, 64>}, {pipeline_mode = #tpu.pipeline_mode<synchronous>, transform_indices = @transform_3, window_bounds = array<i64: 64, 32>}, {pipeline_mode = #tpu.pipeline_mode<synchronous>, transform_indices = @transform_4, window_bounds = array<i64: 1, 32>}, {pipeline_mode = #tpu.pipeline_mode<synchronous>, transform_indices = @transform_5, window_bounds = array<i64: 32, 128>}, {pipeline_mode = #tpu.pipeline_mode<synchronous>, transform_indices = @transform_6, window_bounds = array<i64: 1, 128>}, {transform_indices = @transform_7, window_bounds = array<i64: 64, 128>}]} {
    %c0 = arith.constant 0 : index
    %c0_0 = arith.constant 0 : index
    %0 = vector.load %arg1[%c0, %c0_0] : memref<64x32xf32, #tpu.memory_space<vmem>>, vector<64x32xf32>
    %c0_1 = arith.constant 0 : index
    %c0_2 = arith.constant 0 : index
    %1 = vector.load %arg2[%c0_1, %c0_2] : memref<32x64xf32, #tpu.memory_space<vmem>>, vector<32x64xf32>
    %cst = arith.constant dense<0.000000e+00> : vector<64x64xf32>
    %2 = tpu.matmul %0, %1, %cst {dimension_numbers = #tpu.dot_dimension_numbers<[1], [0], [0], [1], [0, 0, 1, 1], [], []>} : vector<64x32xf32>, vector<32x64xf32>, vector<64x64xf32> -> vector<64x64xf32>
    %c0_3 = arith.constant 0 : index
    %c0_4 = arith.constant 0 : index
    %3 = vector.load %arg3[%c0_3, %c0_4] : memref<1x64xf32, #tpu.memory_space<vmem>>, vector<1x64xf32>
    %4 = vector.broadcast %3 : vector<1x64xf32> to vector<64x64xf32>
    %5 = arith.addf %2, %4 : vector<64x64xf32>
    %cst_5 = arith.constant 0.000000e+00 : f32
    %6 = vector.broadcast %cst_5 : f32 to vector<64x64xf32>
    %7 = arith.maximumf %5, %6 : vector<64x64xf32>
    %c0_6 = arith.constant 0 : index
    %c0_7 = arith.constant 0 : index
    %8 = vector.load %arg4[%c0_6, %c0_7] : memref<64x32xf32, #tpu.memory_space<vmem>>, vector<64x32xf32>
    %cst_8 = arith.constant dense<0.000000e+00> : vector<64x32xf32>
    %9 = tpu.matmul %7, %8, %cst_8 {dimension_numbers = #tpu.dot_dimension_numbers<[1], [0], [0], [1], [0, 0, 1, 1], [], []>} : vector<64x64xf32>, vector<64x32xf32>, vector<64x32xf32> -> vector<64x32xf32>
    %c0_9 = arith.constant 0 : index
    %c0_10 = arith.constant 0 : index
    %10 = vector.load %arg5[%c0_9, %c0_10] : memref<1x32xf32, #tpu.memory_space<vmem>>, vector<1x32xf32>
    %11 = vector.broadcast %10 : vector<1x32xf32> to vector<64x32xf32>
    %12 = arith.addf %9, %11 : vector<64x32xf32>
    %cst_11 = arith.constant 0.000000e+00 : f32
    %13 = vector.broadcast %cst_11 : f32 to vector<64x32xf32>
    %14 = arith.maximumf %12, %13 : vector<64x32xf32>
    %c0_12 = arith.constant 0 : index
    %c0_13 = arith.constant 0 : index
    %15 = vector.load %arg6[%c0_12, %c0_13] : memref<32x128xf32, #tpu.memory_space<vmem>>, vector<32x128xf32>
    %cst_14 = arith.constant dense<0.000000e+00> : vector<64x128xf32>
    %16 = tpu.matmul %14, %15, %cst_14 {dimension_numbers = #tpu.dot_dimension_numbers<[1], [0], [0], [1], [0, 0, 1, 1], [], []>} : vector<64x32xf32>, vector<32x128xf32>, vector<64x128xf32> -> vector<64x128xf32>
    %c0_15 = arith.constant 0 : index
    %c0_16 = arith.constant 0 : index
    %17 = vector.load %arg7[%c0_15, %c0_16] : memref<1x128xf32, #tpu.memory_space<vmem>>, vector<1x128xf32>
    %18 = vector.broadcast %17 : vector<1x128xf32> to vector<64x128xf32>
    %19 = arith.addf %16, %18 : vector<64x128xf32>
    %c0_17 = arith.constant 0 : index
    %c0_18 = arith.constant 0 : index
    %20 = vector.load %arg8[%c0_17, %c0_18] : memref<64x128xf32, #tpu.memory_space<vmem>>, vector<64x128xf32>
    tpu.vector_store %arg8[%c0_17, %c0_18], %19 {strides = array<i32>} : memref<64x128xf32, #tpu.memory_space<vmem>>, vector<64x128xf32>,
    return
  }
  func.func @transform_0(%arg0: i32) -> (i32, i32) {
    %c0_i32 = arith.constant 0 : i32
    %c0_i32_0 = arith.constant 0 : i32
    return %arg0, %c0_i32 : i32, i32
  }
  func.func @transform_1(%arg0: i32) -> (i32, i32) {
    %c0_i32 = arith.constant 0 : i32
    %c0_i32_0 = arith.constant 0 : i32
    %c0_i32_1 = arith.constant 0 : i32
    return %c0_i32, %c0_i32_0 : i32, i32
  }
  func.func @transform_2(%arg0: i32) -> (i32, i32) {
    %c0_i32 = arith.constant 0 : i32
    %c0_i32_0 = arith.constant 0 : i32
    %c0_i32_1 = arith.constant 0 : i32
    return %c0_i32, %c0_i32_0 : i32, i32
  }
  func.func @transform_3(%arg0: i32) -> (i32, i32) {
    %c0_i32 = arith.constant 0 : i32
    %c0_i32_0 = arith.constant 0 : i32
    %c0_i32_1 = arith.constant 0 : i32
    return %c0_i32, %c0_i32_0 : i32, i32
  }
  func.func @transform_4(%arg0: i32) -> (i32, i32) {
    %c0_i32 = arith.constant 0 : i32
    %c0_i32_0 = arith.constant 0 : i32
    %c0_i32_1 = arith.constant 0 : i32
    return %c0_i32, %c0_i32_0 : i32, i32
  }
  func.func @transform_5(%arg0: i32) -> (i32, i32) {
    %c0_i32 = arith.constant 0 : i32
    %c0_i32_0 = arith.constant 0 : i32
    %c0_i32_1 = arith.constant 0 : i32
    return %c0_i32, %c0_i32_0 : i32, i32
  }
  func.func @transform_6(%arg0: i32) -> (i32, i32) {
    %c0_i32 = arith.constant 0 : i32
    %c0_i32_0 = arith.constant 0 : i32
    %c0_i32_1 = arith.constant 0 : i32
    return %c0_i32, %c0_i32_0 : i32, i32
  }
  func.func @transform_7(%arg0: i32) -> (i32, i32) {
    %c0_i32 = arith.constant 0 : i32
    %c0_i32_0 = arith.constant 0 : i32
    return %arg0, %c0_i32 : i32, i32
  }
}

</mosaic_0001>

<bundles_post_ra>
// kernel: encoder_forward.1
= control target key start
LH: loop header
LB: loop body
LE: loop exit
PB: predicated region body
PF: predicated region fallthrough
CT: control target
= control target key end

     0   :  { %vm45_vm0 = vcmask 261120   ;;  %vm198_vm1 = vcmask 523264   ;;  %s800_s1 = inlined_call_operand.vmem [shape: f32[32,64], index: 1, kind: input, shape index: {}]   ;;  %s801_s0 = inlined_call_operand.vmem [shape: f32[64,32], index: 0, kind: input, shape index: {}]   ;;  %s802_s3 = inlined_call_operand.vmem [shape: f32[64,32], index: 3, kind: input, shape index: {}]   ;;  %s803_s5 = inlined_call_operand.vmem [shape: f32[32,128], index: 5, kind: input, shape index: {}]   ;;  %s804_s2 = inlined_call_operand.vmem [shape: f32[1,64], index: 2, kind: input, shape index: {}]   ;;  %s805_s4 = inlined_call_operand.vmem [shape: f32[1,32], index: 4, kind: input, shape index: {}]   ;;  %s806_s6 = inlined_call_operand.vmem [shape: f32[1,128], index: 6, kind: input, shape index: {}]   ;;  %s807_s7 = inlined_call_operand.vmem [shape: f32[64,128], index: 7, kind: output, shape index: {}]  }
   0x1   :  { %v37_v0 = vld [vmem:[%s800_s1 + $0x18] sm:$0xff]  ;;  %v36_v1 = vld [vmem:[%s800_s1 + $0x10] sm:$0xff]  ;;  %v26_v2 = vld [vmem:[%s801_s0] sm:$0xff] }
   0x2   :  { %555 = vmatprep.subr.mxu0 %v37_v0  ;;  %v35_v3 = vld [vmem:[%s800_s1 + $0x8] sm:$0xff]  ;;  %563 = vmatprep.mubr.msk.f32.mxu0 %vm45_vm0, %v26_v2  ;;  %v34_v4 = vld [vmem:[%s800_s1] sm:$0xff]  ;;  %v190_v5 = vld [vmem:[%s802_s3 + $0x38] sm:$0xff] }
   0x3   :  { %556 = vmatpush3.msra.mxu0 %v37_v0  ;;  %v189_v6 = vld [vmem:[%s802_s3 + $0x30] sm:$0xff]  ;;  %575 = vmatprep.subr.mxu1 %v190_v5  ;;  %v27_v7 = vld [vmem:[%s801_s0 + $0x8] sm:$0xff]  ;;  %v187_v10 = vld [vmem:[%s802_s3 + $0x20] sm:$0xff] }
   0x4   :  { %557 = vmatprep.subr.mxu0 %v36_v1  ;;  %576 = vmatpush3.msra.mxu1 %v190_v5  ;;  %v188_v8 = vld [vmem:[%s802_s3 + $0x28] sm:$0xff]  ;;  %v28_v9 = vld [vmem:[%s801_s0 + $0x10] sm:$0xff]  ;;  %v29_v11 = vld [vmem:[%s801_s0 + $0x18] sm:$0xff] }
   0x5   :  { %558 = vmatpush3.msra.mxu0 %v36_v1  ;;  %577 = vmatprep.subr.mxu1 %v189_v6  ;;  %v30_v12 = vld [vmem:[%s801_s0 + $0x20] sm:$0xff]  ;;  %v31_v13 = vld [vmem:[%s801_s0 + $0x28] sm:$0xff]  ;;  %v32_v14 = vld [vmem:[%s801_s0 + $0x30] sm:$0xff] }
   0x6   :  { %559 = vmatprep.subr.mxu0 %v35_v3  ;;  %578 = vmatpush3.msra.mxu1 %v189_v6  ;;  %v33_v15 = vld [vmem:[%s801_s0 + $0x38] sm:$0xff]  ;;  %v185_v17 = vld [vmem:[%s802_s3 + $0x10] sm:$0xff]  ;;  %v184_v18 = vld [vmem:[%s802_s3 + $0x8] sm:$0xff] }
   0x7   :  { %560 = vmatpush3.msra.mxu0 %v35_v3  ;;  %579 = vmatprep.subr.mxu1 %v188_v8  ;;  %v186_v16 = vld [vmem:[%s802_s3 + $0x18] sm:$0xff]  ;;  %v183_v19 = vld [vmem:[%s802_s3] sm:$0xff]  ;;  %v338_v21 = vld [vmem:[%s803_s5 + $0x10] sm:$0xff] }
   0x8   :  { %561 = vmatprep.subr.mxu0 %v34_v4  ;;  %580 = vmatpush3.msra.mxu1 %v188_v8  ;;  %v339_v20 = vld [vmem:[%s803_s5 + $0x18] sm:$0xff]  ;;  %v488_v22 = vld [vmem:[%s804_s2] ss:$0 sm:$0xff]  ;;  %v337_v47 = vld [vmem:[%s803_s5 + $0x8] sm:$0xff] }
   0x9   :  { %562 = vmatpush3.msra.mxu0 %v34_v4  ;;  %581 = vmatprep.subr.mxu1 %v187_v10  ;;  %v336_v48 = vld [vmem:[%s803_s5] sm:$0xff] }
   0xa   :  { %564 = vmatmul.mubr.msk.f32.vlgmr.msra.gmra.mxu0 %vm45_vm0, %v27_v7  ;;  %582 = vmatpush3.msra.mxu1 %v187_v10  ;;  %v497_v49 = vld [vmem:[%s805_s4] ss:$0 sm:$0xff] }
   0xb   :  { %566 = vmatprep.mubr.msk.f32.mxu0 %vm45_vm0, %v28_v9  ;;  %583 = vmatprep.subr.mxu1 %v186_v16  ;;  %v506_v10 = vld [vmem:[%s806_s6] ss:$0 sm:$0xff] }
   0xc   :  { %584 = vmatpush3.msra.mxu1 %v186_v16  ;;  %603 = vmatprep.subr.mxu0 %v339_v20 }
   0xd   :  { %585 = vmatprep.subr.mxu1 %v185_v17  ;;  %604 = vmatpush3.msra.mxu0 %v339_v20 }
   0xe   :  { %567 = vmatmul.mubr.msk.f32.gmra.mxu0 %vm45_vm0, %v29_v11  ;;  %586 = vmatpush3.msra.mxu1 %v185_v17 }
   0xf   :  { %569 = vmatprep.mubr.msk.f32.mxu0 %vm45_vm0, %v30_v12  ;;  %587 = vmatprep.subr.mxu1 %v184_v18 }
  0x10   :  { %588 = vmatpush3.msra.mxu1 %v184_v18  ;;  %605 = vmatprep.subr.mxu0 %v338_v21 }
  0x11   :  { %589 = vmatprep.subr.mxu1 %v183_v19  ;;  %606 = vmatpush3.msra.mxu0 %v338_v21 }
  0x12   :  { %570 = vmatmul.mubr.msk.f32.gmra.mxu0 %vm45_vm0, %v31_v13  ;;  %590 = vmatpush3.msra.mxu1 %v183_v19 }
  0x13   :  { %572 = vmatprep.mubr.msk.f32.mxu0 %vm45_vm0, %v32_v14  ;;  %623 = vmatprep.subr.mxu1 %v339_v20 }
  0x14   :  { %607 = vmatprep.subr.mxu0 %v337_v47 }
  0x15   :  { %608 = vmatpush3.msra.mxu0 %v337_v47 }
  0x16   :  { %573 = vmatmul.mubr.msk.f32.gmra.mxu0 %vm45_vm0, %v33_v15  ;;  %609 = vmatprep.subr.mxu0 %v336_v48 }
  0x17   :  { %610 = vmatpush3.msra.mxu0 %v336_v48 }
  0xca   :  { %v565_v23 = vpop.f32.mrf.mxu0 }
  0xcb   :  { %v142_v24 = vadd.f32 %v565_v23, %v488_v22 }
  0xcc   :  { %v136_v25 = vpop.f32.mrf.mxu0 }
  0xcd   :  { %v137_v26 = vadd.f32 %v488_v22, %v136_v25  ;;  %v176_v29 = vmax.f32 %v142_v24, 0.0 }
  0xce   :  { %v568_v27 = vpop.f32.mrf.mxu0 }
  0xcf   :  { %v175_v28 = vmax.f32 %v137_v26, 0.0  ;;  %v152_v30 = vadd.f32 %v568_v27, %v488_v22 }
  0xd0   :  { %v146_v31 = vpop.f32.mrf.mxu0 }
  0xd1   :  { %v147_v32 = vadd.f32 %v488_v22, %v146_v31  ;;  %591 = vmatprep.mubr.msk.f32.mxu1 %vm198_vm1, %v175_v28  ;;  %v178_v35 = vmax.f32 %v152_v30, 0.0 }
  0xd2   :  { %v571_v33 = vpop.f32.mrf.mxu0  ;;  %592 = vmatmul.mubr.msk.f32.vlgmr.msra.gmra.mxu1 %vm198_vm1, %v176_v29 }
  0xd3   :  { %v177_v34 = vmax.f32 %v147_v32, 0.0  ;;  %627 = vmatpush3.msra.mxu1 %v339_v20  ;;  %v162_v36 = vadd.f32 %v571_v33, %v488_v22 }
  0xd4   :  { %v156_v37 = vpop.f32.mrf.mxu0  ;;  %624 = vmatprep.subr.mxu1 %v338_v21 }
  0xd5   :  { %v157_v38 = vadd.f32 %v488_v22, %v156_v37  ;;  %594 = vmatprep.mubr.msk.f32.mxu1 %vm198_vm1, %v177_v34  ;;  %628 = vmatpush3.msra.mxu1 %v338_v21  ;;  %v180_v41 = vmax.f32 %v162_v36, 0.0 }
  0xd6   :  { %v574_v39 = vpop.f32.mrf.mxu0  ;;  %595 = vmatmul.mubr.msk.f32.gmra.mxu1 %vm198_vm1, %v178_v35  ;;  %625 = vmatprep.subr.mxu1 %v337_v47 }
  0xd7   :  { %v179_v40 = vmax.f32 %v157_v38, 0.0  ;;  %v172_v42 = vadd.f32 %v574_v39, %v488_v22  ;;  %629 = vmatpush3.msra.mxu1 %v337_v47 }
  0xd8   :  { %v166_v43 = vpop.f32.mrf.mxu0  ;;  %626 = vmatprep.subr.mxu1 %v336_v48 }
  0xd9   :  { %v167_v44 = vadd.f32 %v488_v22, %v166_v43  ;;  %597 = vmatprep.mubr.msk.f32.mxu1 %vm198_vm1, %v179_v40  ;;  %v182_v46 = vmax.f32 %v172_v42, 0.0  ;;  %630 = vmatpush3.msra.mxu1 %v336_v48 }
  0xda   :  { %598 = vmatmul.mubr.msk.f32.gmra.mxu1 %vm198_vm1, %v180_v41 }
  0xdb   :  { %v181_v45 = vmax.f32 %v167_v44, 0.0 }
  0xdd   :  { %600 = vmatprep.mubr.msk.f32.mxu1 %vm198_vm1, %v181_v45 }
  0xde   :  { %601 = vmatmul.mubr.msk.f32.gmra.mxu1 %vm198_vm1, %v182_v46 }
 0x192   :  { %v593_v50 = vpop.f32.mrf.mxu1 }
 0x193   :  { %v295_v51 = vadd.f32 %v593_v50, %v497_v49 }
 0x194   :  { %v289_v52 = vpop.f32.mrf.mxu1 }
 0x195   :  { %v290_v53 = vadd.f32 %v497_v49, %v289_v52  ;;  %v329_v56 = vmax.f32 %v295_v51, 0.0 }
 0x196   :  { %v596_v54 = vpop.f32.mrf.mxu1 }
 0x197   :  { %v328_v55 = vmax.f32 %v290_v53, 0.0  ;;  %v305_v57 = vadd.f32 %v596_v54, %v497_v49 }
 0x198   :  { %v299_v58 = vpop.f32.mrf.mxu1 }
 0x199   :  { %v300_v59 = vadd.f32 %v497_v49, %v299_v58  ;;  %611 = vmatprep.mubr.msk.f32.mxu0 %vm45_vm0, %v328_v55  ;;  %v331_v62 = vmax.f32 %v305_v57, 0.0 }
 0x19a   :  { %v599_v60 = vpop.f32.mrf.mxu1  ;;  %612 = vmatmul.mubr.msk.f32.vlgmr.msra.gmra.mxu0 %vm45_vm0, %v329_v56 }
 0x19b   :  { %v330_v61 = vmax.f32 %v300_v59, 0.0  ;;  %v315_v63 = vadd.f32 %v599_v60, %v497_v49 }
 0x19c   :  { %v309_v0 = vpop.f32.mrf.mxu1 }
 0x19d   :  { %v310_v1 = vadd.f32 %v497_v49, %v309_v0  ;;  %614 = vmatprep.mubr.msk.f32.mxu0 %vm45_vm0, %v330_v61  ;;  %v333_v4 = vmax.f32 %v315_v63, 0.0 }
 0x19e   :  { %v602_v2 = vpop.f32.mrf.mxu1  ;;  %615 = vmatmul.mubr.msk.f32.gmra.mxu0 %vm45_vm0, %v331_v62 }
 0x19f   :  { %v332_v3 = vmax.f32 %v310_v1, 0.0  ;;  %v325_v5 = vadd.f32 %v602_v2, %v497_v49 }
 0x1a0   :  { %v319_v6 = vpop.f32.mrf.mxu1 }
 0x1a1   :  { %v320_v7 = vadd.f32 %v497_v49, %v319_v6  ;;  %617 = vmatprep.mubr.msk.f32.mxu0 %vm45_vm0, %v332_v3  ;;  %v335_v9 = vmax.f32 %v325_v5, 0.0 }
 0x1a2   :  { %618 = vmatmul.mubr.msk.f32.gmra.mxu0 %vm45_vm0, %v333_v4 }
 0x1a3   :  { %v334_v8 = vmax.f32 %v320_v7, 0.0 }
 0x1a5   :  { %620 = vmatprep.mubr.msk.f32.mxu1 %vm45_vm0, %v334_v8 }
 0x1a6   :  { %621 = vmatmul.mubr.msk.f32.vlgmr.msra.gmra.mxu1 %vm45_vm0, %v335_v9 }
 0x25a   :  { %v613_v11 = vpop.f32.mrf.mxu0 }
 0x25b   :  { %v443_v12 = vadd.f32 %v613_v11, %v506_v10 }
 0x25c   :  { %v437_v13 = vpop.f32.mrf.mxu0 }
 0x25d   :  { %477 = vst [vmem:[%s807_s7 + $0x8] sm:$0xff] %v443_v12  ;;  %v438_v14 = vadd.f32 %v506_v10, %v437_v13 }
 0x25e   :  { %v616_v15 = vpop.f32.mrf.mxu0 }
 0x25f   :  { %476 = vst [vmem:[%s807_s7] sm:$0xff] %v438_v14  ;;  %v453_v16 = vadd.f32 %v616_v15, %v506_v10 }
 0x260   :  { %v447_v17 = vpop.f32.mrf.mxu0 }
 0x261   :  { %479 = vst [vmem:[%s807_s7 + $0x18] sm:$0xff] %v453_v16  ;;  %v448_v18 = vadd.f32 %v506_v10, %v447_v17 }
 0x262   :  { %v619_v19 = vpop.f32.mrf.mxu0 }
 0x263   :  { %478 = vst [vmem:[%s807_s7 + $0x10] sm:$0xff] %v448_v18  ;;  %v463_v20 = vadd.f32 %v619_v19, %v506_v10 }
 0x264   :  { %v457_v21 = vpop.f32.mrf.mxu0 }
 0x265   :  { %481 = vst [vmem:[%s807_s7 + $0x28] sm:$0xff] %v463_v20  ;;  %v458_v22 = vadd.f32 %v506_v10, %v457_v21 }
 0x266   :  { %v622_v23 = vpop.f32.mrf.mxu1 }
 0x267   :  { %480 = vst [vmem:[%s807_s7 + $0x20] sm:$0xff] %v458_v22  ;;  %v473_v24 = vadd.f32 %v622_v23, %v506_v10 }
 0x268   :  { %v467_v25 = vpop.f32.mrf.mxu1 }
 0x269   :  { %483 = vst [vmem:[%s807_s7 + $0x38] sm:$0xff] %v473_v24  ;;  %v468_v26 = vadd.f32 %v506_v10, %v467_v25 }
 0x26b   :  { %482 = vst [vmem:[%s807_s7 + $0x30] sm:$0xff] %v468_v26 }

</bundles_post_ra>
